<compile_context>
chip_gen: v7x
topology: tpu7x:2x2x1
jax: 0.10.0
libtpu: 0.0.40
codegen_flags: <defaults>
</compile_context>

<pallas_src>
import jax
import jax.numpy as jnp
from jax.experimental import pallas as pl
from jax.experimental.pallas import tpu as pltpu


# ----------------------------- kernels -------------------------------------


def _stats_kernel(x_ref, sum_ref, sumsq_ref):
    """Accumulate per-channel sum and sum-of-squares for one chunk of rows."""
    i = pl.program_id(1)

    @pl.when(i == 0)
    def _():
        sum_ref[...] = jnp.zeros_like(sum_ref)
        sumsq_ref[...] = jnp.zeros_like(sumsq_ref)

    x = x_ref[...].astype(jnp.float32)             # (tn, C, HW)
    # Reduce the leading (row) axis first on the VALU, then lanes on the XLU.
    ps = jnp.sum(x, axis=0, keepdims=True)         # (1, C, HW)
    psq = jnp.sum(x * x, axis=0, keepdims=True)    # (1, C, HW)
    sum_ref[...] += jnp.sum(ps, axis=2, keepdims=True)      # (1, C, 1)
    sumsq_ref[...] += jnp.sum(psq, axis=2, keepdims=True)   # (1, C, 1)


def _normalize_kernel(x_ref, scale_ref, shift_ref, o_ref):
    """y = x * scale + shift   (scale/shift already fold mean/var/gamma/beta)."""
    x = x_ref[...].astype(jnp.float32)
    o_ref[...] = (x * scale_ref[...] + shift_ref[...]).astype(o_ref.dtype)


# ----------------------------- wrapper --------------------------------------


def _largest_divisor_tile(n_rows, row_bytes, target_bytes):
    """Largest divisor of n_rows whose block is <= target_bytes (>=1)."""
    tn = int(max(1, min(n_rows, target_bytes // max(row_bytes, 1))))
    while n_rows % tn:
        tn -= 1
    return tn


def td_batchnorm(x, gamma, beta, *, eps=1e-5, target_block_bytes=4 << 20):
    """x: [T, B, C, H, W]. Returns same shape/dtype."""
    T, B, C, H, W = x.shape
    N = T * B
    HW = H * W

    xr = x.reshape(N, C, HW)                      # free: contiguous view
    row_bytes = C * HW * x.dtype.itemsize
    tn = _largest_divisor_tile(N, row_bytes, target_block_bytes)
    steps_total = N // tn
    # Split the stats reduction across both TensorCores where possible
    # (v7x megacore); harmless (single chunk) on 1-TC chips.
    split = 2 if steps_total % 2 == 0 else 1
    steps = steps_total // split

    # ---- Pass 1: per-channel sum / sum-of-squares ---------------------------
    part_sum, part_sumsq = pl.pallas_call(
        _stats_kernel,
        out_shape=(
            jax.ShapeDtypeStruct((split, C, 1), jnp.float32),
            jax.ShapeDtypeStruct((split, C, 1), jnp.float32),
        ),
        grid_spec=pltpu.PrefetchScalarGridSpec(
            num_scalar_prefetch=0,
            grid=(split, steps),
            in_specs=[pl.BlockSpec((tn, C, HW),
                                   lambda s, i: (s * steps + i, 0, 0))],
            out_specs=(
                pl.BlockSpec((1, C, 1), lambda s, i: (s, 0, 0)),
                pl.BlockSpec((1, C, 1), lambda s, i: (s, 0, 0)),
            ),
        ),
        compiler_params=pltpu.CompilerParams(
            dimension_semantics=("parallel", "arbitrary")),
    )(xr)

    # ---- Fold stats + affine into per-channel scale/shift (tiny JAX ops) ----
    count = jnp.float32(N * HW)
    sums = jnp.sum(part_sum, axis=(0, 2))          # (C,)
    sumsqs = jnp.sum(part_sumsq, axis=(0, 2))      # (C,)
    mean = sums / count
    # NOTE: E[x^2]-E[x]^2 in f32; clamp to >=0 to guard cancellation.
    var = jnp.maximum(sumsqs / count - mean * mean, 0.0)
    inv_std = jax.lax.rsqrt(var + jnp.float32(eps))
    scale_c = gamma.astype(jnp.float32) * inv_std          # (C,)
    shift_c = beta.astype(jnp.float32) - mean * scale_c    # (C,)
    scale = scale_c.reshape(1, C, 1)
    shift = shift_c.reshape(1, C, 1)

    # ---- Pass 2: elementwise normalize (fused multiply-add) -----------------
    yr = pl.pallas_call(
        _normalize_kernel,
        out_shape=jax.ShapeDtypeStruct((N, C, HW), x.dtype),
        grid_spec=pltpu.PrefetchScalarGridSpec(
            num_scalar_prefetch=0,
            grid=(steps_total,),
            in_specs=[
                pl.BlockSpec((tn, C, HW), lambda i: (i, 0, 0)),
                pl.BlockSpec((1, C, 1), lambda i: (0, 0, 0)),
                pl.BlockSpec((1, C, 1), lambda i: (0, 0, 0)),
            ],
            out_specs=pl.BlockSpec((tn, C, HW), lambda i: (i, 0, 0)),
        ),
        compiler_params=pltpu.CompilerParams(
            dimension_semantics=("parallel",)),
    )(xr, scale, shift)

    return yr.reshape(T, B, C, H, W)


# ----------------------------- reference ------------------------------------


def td_batchnorm_ref(x, gamma, beta, eps=1e-5):
    T, B, C, H, W = x.shape
    xf = x.reshape(T * B, C, H, W)
    mean = jnp.mean(xf, axis=(0, 2, 3), keepdims=True)
    var = jnp.mean((xf - mean) ** 2, axis=(0, 2, 3), keepdims=True)
    y = (xf - mean) / jnp.sqrt(var + eps)
    y = y * gamma.reshape(1, C, 1, 1) + beta.reshape(1, C, 1, 1)
    return y.reshape(T, B, C, H, W)


# ------------------------------- main ---------------------------------------


if __name__ == "__main__":
    T, B, C, H, W = 8, 2, 4, 16, 16
    key = jax.random.PRNGKey(0)
    x = jax.random.normal(key, (T, B, C, H, W), dtype=jnp.float32)

    # nn.BatchNorm2d deterministic init: weight=1, bias=0.
    gamma = jnp.ones((C,), dtype=jnp.float32)
    beta = jnp.zeros((C,), dtype=jnp.float32)

    y = td_batchnorm(x, gamma, beta)
    y = jax.block_until_ready(y)

    y_ref = td_batchnorm_ref(x, gamma, beta)
    assert y.shape == (T, B, C, H, W)
    assert jnp.allclose(y, y_ref, atol=1e-4, rtol=1e-4)

    print("KERNEL_OK")
</pallas_src>

<mosaic_0001>
module attributes {stable_mosaic.version = 11 : i64} {
  func.func @_stats_kernel(%arg0: i32, %arg1: i32, %arg2: memref<16x4x256xf32, #tpu.memory_space<vmem>>, %arg3: memref<1x4x1xf32, #tpu.memory_space<vmem>>, %arg4: memref<1x4x1xf32, #tpu.memory_space<vmem>>) attributes {dimension_semantics = [#tpu.dimension_semantics<parallel>, #tpu.dimension_semantics<arbitrary>], iteration_bounds = array<i64: 1, 1>, scalar_prefetch = 0 : i64, scratch_operands = 0 : i64, tpu.core_type = #tpu.core_type<tc>, window_params = [{transform_indices = @transform_0, window_bounds = array<i64: 16, 4, 256>}, {transform_indices = @transform_1, window_bounds = array<i64: 1, 4, 1>}, {transform_indices = @transform_2, window_bounds = array<i64: 1, 4, 1>}]} {
    %c0_i32 = arith.constant 0 : i32
    %0 = arith.cmpi eq, %arg1, %c0_i32 : i32
    %1 = arith.extui %0 : i1 to i32
    %c0_i32_0 = arith.constant 0 : i32
    %2 = arith.cmpi ne, %1, %c0_i32_0 : i32
    scf.if %2 {
      %cst_18 = arith.constant 0.000000e+00 : f32
      %19 = vector.broadcast %cst_18 : f32 to vector<1x4x1xf32>
      %c0_19 = arith.constant 0 : index
      %c0_20 = arith.constant 0 : index
      %c0_21 = arith.constant 0 : index
      %20 = vector.load %arg3[%c0_19, %c0_20, %c0_21] : memref<1x4x1xf32, #tpu.memory_space<vmem>>, vector<1x4x1xf32>
      tpu.vector_store %arg3[%c0_19, %c0_20, %c0_21], %19 {strides = array<i32>} : memref<1x4x1xf32, #tpu.memory_space<vmem>>, vector<1x4x1xf32>,
      %cst_22 = arith.constant 0.000000e+00 : f32
      %21 = vector.broadcast %cst_22 : f32 to vector<1x4x1xf32>
      %c0_23 = arith.constant 0 : index
      %c0_24 = arith.constant 0 : index
      %c0_25 = arith.constant 0 : index
      %22 = vector.load %arg4[%c0_23, %c0_24, %c0_25] : memref<1x4x1xf32, #tpu.memory_space<vmem>>, vector<1x4x1xf32>
      tpu.vector_store %arg4[%c0_23, %c0_24, %c0_25], %21 {strides = array<i32>} : memref<1x4x1xf32, #tpu.memory_space<vmem>>, vector<1x4x1xf32>,
    } else {
    }
    %c0 = arith.constant 0 : index
    %c0_1 = arith.constant 0 : index
    %c0_2 = arith.constant 0 : index
    %3 = vector.load %arg2[%c0, %c0_1, %c0_2] : memref<16x4x256xf32, #tpu.memory_space<vmem>>, vector<16x4x256xf32>
    %cst = arith.constant dense<0.000000e+00> : vector<4x256xf32>
    %4 = vector.multi_reduction <add>, %3, %cst [0] : vector<16x4x256xf32> to vector<4x256xf32>
    %5 = vector.shape_cast %4 : vector<4x256xf32> to vector<1x4x256xf32>
    %6 = arith.mulf %3, %3 : vector<16x4x256xf32>
    %cst_3 = arith.constant dense<0.000000e+00> : vector<4x256xf32>
    %7 = vector.multi_reduction <add>, %6, %cst_3 [0] : vector<16x4x256xf32> to vector<4x256xf32>
    %8 = vector.shape_cast %7 : vector<4x256xf32> to vector<1x4x256xf32>
    %c0_4 = arith.constant 0 : index
    %c0_5 = arith.constant 0 : index
    %c0_6 = arith.constant 0 : index
    %9 = vector.load %arg3[%c0_4, %c0_5, %c0_6] : memref<1x4x1xf32, #tpu.memory_space<vmem>>, vector<1x4x1xf32>
    %cst_7 = arith.constant dense<0.000000e+00> : vector<1x4xf32>
    %10 = vector.multi_reduction <add>, %5, %cst_7 [2] : vector<1x4x256xf32> to vector<1x4xf32>
    %11 = vector.shape_cast %10 : vector<1x4xf32> to vector<1x4x1xf32>
    %12 = arith.addf %9, %11 : vector<1x4x1xf32>
    %c0_8 = arith.constant 0 : index
    %c0_9 = arith.constant 0 : index
    %c0_10 = arith.constant 0 : index
    %13 = vector.load %arg3[%c0_8, %c0_9, %c0_10] : memref<1x4x1xf32, #tpu.memory_space<vmem>>, vector<1x4x1xf32>
    tpu.vector_store %arg3[%c0_8, %c0_9, %c0_10], %12 {strides = array<i32>} : memref<1x4x1xf32, #tpu.memory_space<vmem>>, vector<1x4x1xf32>,
    %c0_11 = arith.constant 0 : index
    %c0_12 = arith.constant 0 : index
    %c0_13 = arith.constant 0 : index
    %14 = vector.load %arg4[%c0_11, %c0_12, %c0_13] : memref<1x4x1xf32, #tpu.memory_space<vmem>>, vector<1x4x1xf32>
    %cst_14 = arith.constant dense<0.000000e+00> : vector<1x4xf32>
    %15 = vector.multi_reduction <add>, %8, %cst_14 [2] : vector<1x4x256xf32> to vector<1x4xf32>
    %16 = vector.shape_cast %15 : vector<1x4xf32> to vector<1x4x1xf32>
    %17 = arith.addf %14, %16 : vector<1x4x1xf32>
    %c0_15 = arith.constant 0 : index
    %c0_16 = arith.constant 0 : index
    %c0_17 = arith.constant 0 : index
    %18 = vector.load %arg4[%c0_15, %c0_16, %c0_17] : memref<1x4x1xf32, #tpu.memory_space<vmem>>, vector<1x4x1xf32>
    tpu.vector_store %arg4[%c0_15, %c0_16, %c0_17], %17 {strides = array<i32>} : memref<1x4x1xf32, #tpu.memory_space<vmem>>, vector<1x4x1xf32>,
    return
  }
  func.func @transform_0(%arg0: i32, %arg1: i32) -> (i32, i32, i32) {
    %c1_i32 = arith.constant 1 : i32
    %0 = arith.muli %arg0, %c1_i32 : i32
    %1 = arith.addi %0, %arg1 : i32
    %c0_i32 = arith.constant 0 : i32
    %c0_i32_0 = arith.constant 0 : i32
    %c0_i32_1 = arith.constant 0 : i32
    return %1, %c0_i32, %c0_i32_0 : i32, i32, i32
  }
  func.func @transform_1(%arg0: i32, %arg1: i32) -> (i32, i32, i32) {
    %c0_i32 = arith.constant 0 : i32
    %c0_i32_0 = arith.constant 0 : i32
    %c0_i32_1 = arith.constant 0 : i32
    return %arg0, %c0_i32, %c0_i32_0 : i32, i32, i32
  }
  func.func @transform_2(%arg0: i32, %arg1: i32) -> (i32, i32, i32) {
    %c0_i32 = arith.constant 0 : i32
    %c0_i32_0 = arith.constant 0 : i32
    %c0_i32_1 = arith.constant 0 : i32
    return %arg0, %c0_i32, %c0_i32_0 : i32, i32, i32
  }
}

</mosaic_0001>

<bundles_post_ra>
// kernel: tpu_custom_call.1
= control target key start
LH: loop header
LB: loop body
LE: loop exit
PB: predicated region body
PF: predicated region fallthrough
CT: control target
= control target key end

     0   :  { %8 = vsyncpa [#allocation3], 0  ;;  %s361_s9 = smov [#allocation2]   ;;  %s594_s0 = inlined_call_operand.hbm [shape: f32[16,4,256], index: 0, kind: input, shape index: {}]   ;;  %s595_s1 = inlined_call_operand.vmem [shape: f32[1,4,1], index: 1, kind: output, shape index: {0}]   ;;  %s596_s2 = inlined_call_operand.vmem [shape: f32[1,4,1], index: 2, kind: output, shape index: {1}]  }
   0x1   :  { %s19_s10 = sshll.u32 %s361_s9, 4  ;;  %s337_s13 = scalar_lea.hbm %s594_s0, 2048  ;;  %s20_s10 = int_to_ptr.vmem [resolvable:$true] %s19_s10 }
   0x2   :  { %p338_p0 = scmp.ne.s32.totalorder %s594_s0, %s337_s13  ;;  %p341_p1 = scmp.lt.u32.totalorder %s337_s13, %s594_s0 }
   0x4   :  { %p343_p2 = pnand %p341_p1, %p338_p0 }
   0x6   :  { %346 = shalt.err (!%p343_p2)
}
   0x7   :  { %s347_s18 = scalar_lea.vmem %s20_s10, 2048  ;;  %p352_p4 = scmp.lt.s32.totalorder %s20_s10, %s20_s10 }
   0x8   :  { %p348_p3 = scmp.ne.s32.totalorder %s20_s10, %s347_s18  ;;  %p353_p5 = scmp.lt.s32.totalorder %s347_s18, %s347_s18 }
   0xa   :  { %p354_p6 = por %p353_p5, %p352_p4 }
   0xc   :  { %p355_p7 = pnand %p354_p6, %p348_p3 }
   0xe   :  { %358 = shalt.err (!%p355_p7)
}
   0xf   :  { %s362_s19 = smov 128   ;;  %s363_s20 = smov 8  }
  0x10   :  { %25 = dma.hbm_to_vmem [thread:$0]  %s594_s0, 2048, %s20_s10, [#allocation3], %s362_s19, %s362_s19, %s363_s20  }
  0x11   :  { %359 = dma.done.wait [#allocation3], 2048  }
  0x12   :  { %360 = vsyncadd [#allocation3], 4294965248  ;;  %vm35_vm0 = vcmask 3072   ;;  %v364_v0 = vmov 0.0   ;;  %vm102_vm1 = vcmask 1043456   ;;  %v400_v1 = vld [vmem:[#allocation2] sm:$0xff] }
  0x13   :  { %36 = vst.msk [vmem:[%s595_s1] sm:$0xf] %vm35_vm0, %v364_v0  ;;  %37 = vst.msk [vmem:[%s596_s2] sm:$0xf] %vm35_vm0, %v364_v0  ;;  %v402_v2 = vld [vmem:[#allocation2 + $0x8] sm:$0xff]  ;;  %v103_v3 = vsel %vm102_vm1, %v400_v1, 0.0  ;;  %v70_v10 = vcombine.high %v400_v1, %v400_v1 }
  0x14   :  { %v104_v4 = vsel %vm102_vm1, %v402_v2, 0.0  ;;  %v408_v5 = vld [vmem:[#allocation2 + $0x10] sm:$0xff]  ;;  %v412_v8 = vld [vmem:[#allocation2 + $0x18] sm:$0xff]  ;;  %v414_v9 = vld [vmem:[#allocation2 + $0x20] sm:$0xff]  ;;  %v71_v12 = vcombine.high %v402_v2, %v402_v2 }
  0x15   :  { %v105_v6 = vadd.f32 %v104_v4, %v103_v3  ;;  %v106_v7 = vsel %vm102_vm1, %v408_v5, 0.0  ;;  %v72_v13 = vcombine.high %v408_v5, %v408_v5  ;;  %v108_v14 = vsel %vm102_vm1, %v412_v8, 0.0  ;;  %v426_v16 = vld [vmem:[#allocation2 + $0x28] sm:$0xff]  ;;  %v432_v20 = vld [vmem:[#allocation2 + $0x30] sm:$0xff]  ;;  %v441_v27 = vld [vmem:[#allocation2 + $0x38] sm:$0xff] }
  0x16   :  { %v110_v15 = vsel %vm102_vm1, %v414_v9, 0.0  ;;  %v73_v18 = vcombine.high %v412_v8, %v412_v8  ;;  %v112_v19 = vsel %vm102_vm1, %v426_v16, 0.0  ;;  %v74_v21 = vcombine.high %v414_v9, %v414_v9  ;;  %v448_v33 = vld [vmem:[#allocation2 + $0x40] sm:$0xff]  ;;  %v455_v39 = vld [vmem:[#allocation2 + $0x48] sm:$0xff]  ;;  %v457_v42 = vld [vmem:[#allocation2 + $0x50] sm:$0xff] }
  0x17   :  { %v107_v11 = vadd.f32 %v106_v7, %v105_v6  ;;  %v114_v23 = vsel %vm102_vm1, %v432_v20, 0.0  ;;  %v134_v24 = vsel %vm102_vm1, %v70_v10, 0.0  ;;  %v135_v25 = vsel %vm102_vm1, %v71_v12, 0.0  ;;  %v459_v43 = vld [vmem:[#allocation2 + $0x58] sm:$0xff]  ;;  %v466_v47 = vld [vmem:[#allocation2 + $0x60] sm:$0xff]  ;;  %v468_v48 = vld [vmem:[#allocation2 + $0x68] sm:$0xff] }
  0x18   :  { %v137_v26 = vsel %vm102_vm1, %v72_v13, 0.0  ;;  %v136_v29 = vadd.f32 %v135_v25, %v134_v24  ;;  %v75_v30 = vcombine.high %v426_v16, %v426_v16  ;;  %v116_v31 = vsel %vm102_vm1, %v441_v27, 0.0  ;;  %v470_v51 = vld [vmem:[#allocation2 + $0x70] sm:$0xff]  ;;  %v472_v52 = vld [vmem:[#allocation2 + $0x78] sm:$0xff] }
  0x19   :  { %v109_v17 = vadd.f32 %v108_v14, %v107_v11  ;;  %v139_v32 = vsel %vm102_vm1, %v73_v18, 0.0  ;;  %v76_v36 = vcombine.high %v432_v20, %v432_v20  ;;  %v118_v37 = vsel %vm102_vm1, %v448_v33, 0.0 }
  0x1a   :  { %v138_v35 = vadd.f32 %v137_v26, %v136_v29  ;;  %v141_v38 = vsel %vm102_vm1, %v74_v21, 0.0  ;;  %v77_v44 = vcombine.high %v441_v27, %v441_v27  ;;  %v120_v45 = vsel %vm102_vm1, %v455_v39, 0.0 }
  0x1b   :  { %v111_v22 = vadd.f32 %v110_v15, %v109_v17  ;;  %v143_v46 = vsel %vm102_vm1, %v75_v30, 0.0  ;;  %v78_v53 = vcombine.high %v448_v33, %v448_v33  ;;  %v79_v54 = vcombine.high %v455_v39, %v455_v39 }
  0x1c   :  { %v140_v41 = vadd.f32 %v139_v32, %v138_v35  ;;  %v122_v55 = vsel %vm102_vm1, %v457_v42, 0.0  ;;  %v145_v56 = vsel %vm102_vm1, %v76_v36, 0.0  ;;  %v80_v57 = vcombine.high %v457_v42, %v457_v42 }
  0x1d   :  { %v113_v28 = vadd.f32 %v112_v19, %v111_v22  ;;  %v81_v58 = vcombine.high %v459_v43, %v459_v43  ;;  %v82_v61 = vcombine.high %v466_v47, %v466_v47  ;;  %v83_v62 = vcombine.high %v468_v48, %v468_v48 }
  0x1e   :  { %v142_v50 = vadd.f32 %v141_v38, %v140_v41  ;;  %v124_v63 = vsel %vm102_vm1, %v459_v43, 0.0  ;;  %v147_v0 = vsel %vm102_vm1, %v77_v44, 0.0  ;;  %v84_v3 = vcombine.high %v470_v51, %v470_v51 }
  0x1f   :  { %v115_v34 = vadd.f32 %v114_v23, %v113_v28  ;;  %v85_v4 = vcombine.high %v472_v52, %v472_v52  ;;  %v126_v10 = vsel %vm102_vm1, %v466_v47, 0.0  ;;  %v128_v11 = vsel %vm102_vm1, %v468_v48, 0.0 }
  0x20   :  { %v144_v60 = vadd.f32 %v143_v46, %v142_v50  ;;  %v130_v12 = vsel %vm102_vm1, %v470_v51, 0.0  ;;  %v149_v13 = vsel %vm102_vm1, %v78_v53, 0.0  ;;  %v132_v15 = vsel %vm102_vm1, %v472_v52, 0.0 }
  0x21   :  { %v117_v40 = vadd.f32 %v116_v31, %v115_v34  ;;  %v151_v18 = vsel %vm102_vm1, %v79_v54, 0.0  ;;  %v153_v19 = vsel %vm102_vm1, %v80_v57, 0.0  ;;  %v165_v21 = vmul.f32 %v400_v1, %v400_v1 }
  0x22   :  { %v146_v7 = vadd.f32 %v145_v56, %v144_v60  ;;  %v166_v22 = vmul.f32 %v402_v2, %v402_v2  ;;  %v167_v23 = vmul.f32 %v408_v5, %v408_v5  ;;  %v155_v26 = vsel %vm102_vm1, %v81_v58, 0.0 }
  0x23   :  { %v119_v49 = vadd.f32 %v118_v37, %v117_v40  ;;  %v157_v28 = vsel %vm102_vm1, %v82_v61, 0.0  ;;  %v168_v29 = vmul.f32 %v412_v8, %v412_v8  ;;  %v229_v30 = vsel %vm102_vm1, %v165_v21, 0.0 }
  0x24   :  { %v148_v17 = vadd.f32 %v147_v0, %v146_v7  ;;  %v230_v31 = vsel %vm102_vm1, %v166_v22, 0.0  ;;  %v232_v1 = vsel %vm102_vm1, %v167_v23, 0.0  ;;  %v169_v5 = vmul.f32 %v414_v9, %v414_v9 }
  0x25   :  { %v121_v59 = vadd.f32 %v120_v45, %v119_v49  ;;  %v231_v34 = vadd.f32 %v230_v31, %v229_v30  ;;  %v197_v35 = vcombine.high %v165_v21, %v165_v21  ;;  %v198_v36 = vcombine.high %v166_v22, %v166_v22 }
  0x26   :  { %v150_v25 = vadd.f32 %v149_v13, %v148_v17  ;;  %v199_v37 = vcombine.high %v167_v23, %v167_v23  ;;  %v234_v38 = vsel %vm102_vm1, %v168_v29, 0.0  ;;  %v159_v8 = vsel %vm102_vm1, %v83_v62, 0.0 }
  0x27   :  { %v123_v6 = vadd.f32 %v122_v55, %v121_v59  ;;  %v161_v41 = vsel %vm102_vm1, %v84_v3, 0.0  ;;  %v233_v44 = vadd.f32 %v232_v1, %v231_v34  ;;  %v170_v45 = vmul.f32 %v426_v16, %v426_v16 }
  0x28   :  { %v152_v2 = vadd.f32 %v151_v18, %v150_v25  ;;  %v171_v46 = vmul.f32 %v432_v20, %v432_v20  ;;  %v200_v49 = vcombine.high %v168_v29, %v168_v29  ;;  %v236_v9 = vsel %vm102_vm1, %v169_v5, 0.0 }
  0x29   :  { %v125_v14 = vadd.f32 %v124_v63, %v123_v6  ;;  %v201_v54 = vcombine.high %v169_v5, %v169_v5  ;;  %v235_v55 = vadd.f32 %v234_v38, %v233_v44  ;;  %v238_v56 = vsel %vm102_vm1, %v170_v45, 0.0 }
  0x2a   :  { %v154_v40 = vadd.f32 %v153_v19, %v152_v2  ;;  %v260_v57 = vsel %vm102_vm1, %v197_v35, 0.0  ;;  %v261_v58 = vsel %vm102_vm1, %v198_v36, 0.0  ;;  %v263_v59 = vsel %vm102_vm1, %v199_v37, 0.0 }
  0x2b   :  { %v127_v24 = vadd.f32 %v126_v10, %v125_v14  ;;  %v163_v16 = vsel %vm102_vm1, %v85_v4, 0.0  ;;  %v237_v61 = vadd.f32 %v236_v9, %v235_v55  ;;  %v262_v20 = vadd.f32 %v261_v58, %v260_v57 }
  0x2c   :  { %v156_v53 = vadd.f32 %v155_v26, %v154_v40  ;;  %v172_v62 = vmul.f32 %v441_v27, %v441_v27  ;;  %v202_v63 = vcombine.high %v170_v45, %v170_v45  ;;  %v240_v0 = vsel %vm102_vm1, %v171_v46, 0.0 }
  0x2d   :  { %v129_v32 = vadd.f32 %v128_v11, %v127_v24  ;;  %v265_v3 = vsel %vm102_vm1, %v200_v49, 0.0  ;;  %v239_v10 = vadd.f32 %v238_v56, %v237_v61  ;;  %v264_v11 = vadd.f32 %v263_v59, %v262_v20 }
  0x2e   :  { %v158_v60 = vadd.f32 %v157_v28, %v156_v53  ;;  %v203_v13 = vcombine.high %v171_v46, %v171_v46  ;;  %v242_v4 = vsel %vm102_vm1, %v172_v62, 0.0  ;;  %v267_v14 = vsel %vm102_vm1, %v201_v54, 0.0 }
  0x2f   :  { %v131_v50 = vadd.f32 %v130_v12, %v129_v32  ;;  %v173_v12 = vmul.f32 %v448_v33, %v448_v33  ;;  %v241_v18 = vadd.f32 %v240_v0, %v239_v10  ;;  %v266_v27 = vadd.f32 %v265_v3, %v264_v11 }
  0x30   :  { %v160_v7 = vadd.f32 %v159_v8, %v158_v60  ;;  %v174_v19 = vmul.f32 %v455_v39, %v455_v39  ;;  %v204_v21 = vcombine.high %v172_v62, %v172_v62  ;;  %v269_v22 = vsel %vm102_vm1, %v202_v63, 0.0 }
  0x31   :  { %v133_v6 = vadd.f32 %v132_v15, %v131_v50  ;;  %v244_v15 = vsel %vm102_vm1, %v173_v12, 0.0  ;;  %v243_v33 = vadd.f32 %v242_v4, %v241_v18  ;;  %v268_v25 = vadd.f32 %v267_v14, %v266_v27  ;;  %v291_v27 = vld [vmem:[%s595_s1] sm:$0xf] }
  0x32   :  { %v162_v17 = vadd.f32 %v161_v41, %v160_v7  ;;  %v175_v26 = vmul.f32 %v457_v42, %v457_v42  ;;  %v205_v28 = vcombine.high %v173_v12, %v173_v12  ;;  %v246_v29 = vsel %vm102_vm1, %v174_v19, 0.0 }
  0x33   :  { %v292_v24 = vsel %vm102_vm1, %v133_v6, 0.0  ;;  %v271_v30 = vsel %vm102_vm1, %v203_v13, 0.0  ;;  %v176_v31 = vmul.f32 %v459_v43, %v459_v43  ;;  %v245_v1 = vadd.f32 %v244_v15, %v243_v33  ;;  %v300_v15 = vld [vmem:[%s596_s2] sm:$0xf] }
  0x34   :  { %v164_v23 = vadd.f32 %v163_v16, %v162_v17  ;;  %v270_v32 = vadd.f32 %v269_v22, %v268_v25  ;;  %v206_v5 = vcombine.high %v174_v19, %v174_v19  ;;  %v248_v34 = vsel %vm102_vm1, %v175_v26, 0.0 }
  0x35   :  { %v273_v35 = vsel %vm102_vm1, %v204_v21, 0.0  ;;  %v247_v36 = vadd.f32 %v246_v29, %v245_v1  ;;  %v177_v37 = vmul.f32 %v466_v47, %v466_v47  ;;  %v207_v38 = vcombine.high %v175_v26, %v175_v26 }
  0x36   :  { %v293_v39 = vsel %vm102_vm1, %v164_v23, 0.0  ;;  %v272_v42 = vadd.f32 %v271_v30, %v270_v32  ;;  %v250_v40 = vsel %vm102_vm1, %v176_v31, 0.0  ;;  %v275_v8 = vsel %vm102_vm1, %v205_v28, 0.0 }
  0x37   :  { %v294_v2 = vadd.f32 %v293_v39, %v292_v24  ;;  %v249_v43 = vadd.f32 %v248_v34, %v247_v36  ;;  %v178_v44 = vmul.f32 %v468_v48, %v468_v48  ;;  %v208_v45 = vcombine.high %v176_v31, %v176_v31 }
  0x38   :  { %v274_v41 = vadd.f32 %v273_v35, %v272_v42  ;;  %v252_v46 = vsel %vm102_vm1, %v177_v37, 0.0  ;;  %v277_v49 = vsel %vm102_vm1, %v206_v5, 0.0  ;;  %v179_v47 = vmul.f32 %v470_v51, %v470_v51 }
  0x39   :  { %295 = vadd.xlane.f32.xlu0 %v294_v2  ;;  %v251_v9 = vadd.f32 %v250_v40, %v249_v43  ;;  %v209_v53 = vcombine.high %v177_v37, %v177_v37  ;;  %v254_v54 = vsel %vm102_vm1, %v178_v44, 0.0  ;;  %v279_v55 = vsel %vm102_vm1, %v207_v38, 0.0 }
  0x3a   :  { %v276_v50 = vadd.f32 %v275_v8, %v274_v41  ;;  %v180_v48 = vmul.f32 %v472_v52, %v472_v52  ;;  %v210_v58 = vcombine.high %v178_v44, %v178_v44  ;;  %v256_v59 = vsel %vm102_vm1, %v179_v47, 0.0 }
  0x3b   :  { %v253_v56 = vadd.f32 %v252_v46, %v251_v9  ;;  %v281_v60 = vsel %vm102_vm1, %v208_v45, 0.0  ;;  %v211_v20 = vcombine.high %v179_v47, %v179_v47  ;;  %v283_v51 = vsel %vm102_vm1, %v209_v53, 0.0 }
  0x3c   :  { %v278_v57 = vadd.f32 %v277_v49, %v276_v50  ;;  %v212_v0 = vcombine.high %v180_v48, %v180_v48  ;;  %v258_v3 = vsel %vm102_vm1, %v180_v48, 0.0  ;;  %v285_v6 = vsel %vm102_vm1, %v210_v58, 0.0 }
  0x3d   :  { %v255_v16 = vadd.f32 %v254_v54, %v253_v56  ;;  %v287_v52 = vsel %vm102_vm1, %v211_v20, 0.0 }
  0x3e   :  { %v280_v61 = vadd.f32 %v279_v55, %v278_v57  ;;  %v289_v12 = vsel %vm102_vm1, %v212_v0, 0.0 }
  0x3f   :  { %v257_v62 = vadd.f32 %v256_v59, %v255_v16 }
  0x40   :  { %v282_v63 = vadd.f32 %v281_v60, %v280_v61 }
  0x41   :  { %v259_v10 = vadd.f32 %v258_v3, %v257_v62 }
  0x42   :  { %v284_v7 = vadd.f32 %v283_v51, %v282_v63 }
  0x43   :  { %v301_v14 = vsel %vm102_vm1, %v259_v10, 0.0 }
  0x44   :  { %v286_v11 = vadd.f32 %v285_v6, %v284_v7 }
  0x46   :  { %v288_v13 = vadd.f32 %v287_v52, %v286_v11 }
  0x48   :  { %v290_v4 = vadd.f32 %v289_v12, %v288_v13 }
  0x4a   :  { %v302_v17 = vsel %vm102_vm1, %v290_v4, 0.0 }
  0x4b   :  { %v303_v18 = vadd.f32 %v302_v17, %v301_v14 }
  0x4d   :  { %304 = vadd.xlane.f32.xlu0 %v303_v18 }
  0xc6   :  { %v296_v19 = vpop.xlane.xlu0 %295 }
  0xc7   :  { %v297_v21 = vadd.f32 %v296_v19, %v291_v27 }
  0xc9   :  { %299 = vst.msk [vmem:[%s595_s1] sm:$0xf] %vm35_vm0, %v297_v21 }
  0xda   :  { %v305_v22 = vpop.xlane.xlu0 %304 }
  0xdb   :  { %v306_v23 = vadd.f32 %v305_v22, %v300_v15 }
  0xdd   :  { %307 = vst.msk [vmem:[%s596_s2] sm:$0xf] %vm35_vm0, %v306_v23 }
  0xde   :  { %316 = vsyncpa [#allocation3], 1 }

</bundles_post_ra>
